<compile_context>
chip_gen: v6e
topology: v6e:2x2x1
jax: 0.10.0
libtpu: 0.0.40
codegen_flags: <defaults>
</compile_context>

<pallas_src>
import jax
import jax.numpy as jnp
from jax import lax
from jax.experimental import pallas as pl
from jax.experimental.pallas import tpu as pltpu

NUM_CLASSES = 6
LANES = 128  # lane-dense width for padded operands / output slab


def _round_up(n, m):
    return (n + m - 1) // m * m


def rnn_classify_kernel(tok_ref, ptab_ref, whh_ref, wcls_ref, bcls_ref, out_ref):
    # tok_ref : VMEM [T*B, 1] int32  token ids, row t*B + b = x[b, t]
    # ptab_ref: VMEM [Vp, Dp] f32    projected emb table (E@Wih^T + b_ih + b_hh), zero-padded
    # whh_ref : VMEM [Dp, Dp] f32    W_hh^T, zero-padded
    # wcls_ref: VMEM [Dp, 128] f32   W_cls^T, zero-padded rows/cols
    # bcls_ref: VMEM [1, 128] f32    classifier bias, -1e30 in padded lanes
    # out_ref : VMEM [B, 128] f32    packed result slab
    TB = tok_ref.shape[0]
    B = out_ref.shape[0]
    T = TB // B
    VP = ptab_ref.shape[0]

    # ---- Phase 1: one-hot MXU gather (replaces 64 serialized row copies) -----
    tok = tok_ref[...]                                             # [TB, 1]
    vocab_lane = lax.broadcasted_iota(jnp.int32, (TB, VP), 1)
    onehot = (tok == vocab_lane).astype(jnp.float32)               # [TB, Vp]
    x_all = jnp.dot(onehot, ptab_ref[...],
                    preferred_element_type=jnp.float32)            # [TB, Dp]

    # ---- Phase 2: serial RNN recurrence; h stays in vregs --------------------
    whh = whh_ref[...]                                             # hoisted load
    h = jnp.zeros_like(x_all[:B, :])
    for t in range(T):                                             # T static, fully unrolled
        x_t = x_all[t * B:(t + 1) * B, :]                          # static vreg-aligned slice
        h = jnp.tanh(x_t + jnp.dot(h, whh,
                                   preferred_element_type=jnp.float32))

    # ---- Phase 3: classifier (lane-padded), softmax, max / argmax ------------
    logits = jnp.dot(h, wcls_ref[...],
                     preferred_element_type=jnp.float32) + bcls_ref[...]
    m = jnp.max(logits, axis=-1, keepdims=True)
    e = jnp.exp(logits - m)                         # padded lanes underflow to 0.0
    probs = e * pl.reciprocal(jnp.sum(e, axis=-1, keepdims=True), approx=False)

    pmax = jnp.max(probs, axis=-1, keepdims=True)
    lane = lax.broadcasted_iota(jnp.int32, probs.shape, 1)
    # first-index tie-break, matching torch.max(dim=1)
    idx = jnp.min(jnp.where(probs == pmax, lane, LANES), axis=-1, keepdims=True)

    slab = (probs
            + jnp.where(lane == NUM_CLASSES, pmax, 0.0)
            + jnp.where(lane == NUM_CLASSES + 1, idx.astype(jnp.float32), 0.0))
    out_ref[...] = slab                             # one unmasked [B,128] store


def prepare_params(emb_table, w_ih, w_hh, b_ih, b_hh, w_cls, b_cls):
    """One-time parameter prep: fold input projection + biases into the
    embedding table, pre-transpose, and zero-pad everything lane-dense."""
    VOCAB, D = emb_table.shape
    DP = _round_up(D, LANES)
    VP = _round_up(VOCAB, LANES)

    proj = emb_table @ w_ih.T + b_ih + b_hh                        # [VOCAB, D]
    ptab = jnp.zeros((VP, DP), jnp.float32).at[:VOCAB, :D].set(proj)
    whh_t = jnp.zeros((DP, DP), jnp.float32).at[:D, :D].set(w_hh.T)
    wcls_pad = jnp.zeros((DP, LANES), jnp.float32).at[:D, :NUM_CLASSES].set(w_cls.T)
    bcls_pad = jnp.full((1, LANES), -1e30, jnp.float32).at[0, :NUM_CLASSES].set(b_cls)
    return ptab, whh_t, wcls_pad, bcls_pad


@jax.jit
def torch_model_forward(x_tokens, params):
    """Inference path of TorchModel.forward (y=None)."""
    # TODO(synk): training branch (nn.CrossEntropyLoss on the softmax output) is
    #             not implemented; only the y=None inference path is reproduced.
    ptab, whh_t, wcls_pad, bcls_pad = params
    B, T = x_tokens.shape
    VP, DP = ptab.shape

    # wrapper-side layout plumbing only: row t*B + b = token at (b, t)
    tok_col = x_tokens.astype(jnp.int32).T.reshape(T * B, 1)

    out = pl.pallas_call(
        rnn_classify_kernel,
        out_shape=jax.ShapeDtypeStruct((B, LANES), jnp.float32),
        in_specs=[
            pl.BlockSpec(memory_space=pltpu.MemorySpace.VMEM),   # token ids column
            pl.BlockSpec(memory_space=pltpu.MemorySpace.VMEM),   # projected emb table
            pl.BlockSpec(memory_space=pltpu.MemorySpace.VMEM),   # Whh^T (padded)
            pl.BlockSpec(memory_space=pltpu.MemorySpace.VMEM),   # Wcls^T (padded)
            pl.BlockSpec(memory_space=pltpu.MemorySpace.VMEM),   # bias (padded)
        ],
        out_specs=pl.BlockSpec(memory_space=pltpu.MemorySpace.VMEM),
        cost_estimate=pl.CostEstimate(
            flops=2 * T * B * VP * DP + 2 * T * B * DP * DP + 2 * B * DP * LANES,
            transcendentals=T * B * DP + B * LANES,
            bytes_accessed=(T * B * 4 + VP * DP * 4 + DP * DP * 4
                            + DP * LANES * 4 + LANES * 4 + B * LANES * 4)),
    )(tok_col, ptab, whh_t, wcls_pad, bcls_pad)

    probs = out[:, :NUM_CLASSES]
    vals = out[:, NUM_CLASSES]
    idx = out[:, NUM_CLASSES + 1].astype(jnp.int32)
    return vals, idx, probs


def ref_forward(x_tokens, emb_table, w_ih, w_hh, b_ih, b_hh, w_cls, b_cls):
    emb = emb_table[x_tokens]                                      # [B, T, D]
    h0 = jnp.zeros((x_tokens.shape[0], emb_table.shape[1]), jnp.float32)

    def step(h, x_t):
        return jnp.tanh(x_t @ w_ih.T + b_ih + h @ w_hh.T + b_hh), None

    h_last, _ = lax.scan(step, h0, jnp.transpose(emb, (1, 0, 2)))
    logits = h_last @ w_cls.T + b_cls
    probs = jax.nn.softmax(logits, axis=-1)
    return jnp.max(probs, axis=-1), jnp.argmax(probs, axis=-1), probs


if __name__ == "__main__":
    B, T, D, VOCAB = 8, 8, 32, 30
    key = jax.random.PRNGKey(0)
    ks = jax.random.split(key, 8)

    # deterministic synthetic parameters (shapes follow nn.Embedding / nn.RNN /
    # nn.Linear from the PyTorch module)
    emb_table = jax.random.normal(ks[0], (VOCAB, D), jnp.float32) * 0.5
    w_ih = jax.random.normal(ks[1], (D, D), jnp.float32) * 0.2     # RNN weight_ih_l0
    w_hh = jax.random.normal(ks[2], (D, D), jnp.float32) * 0.2     # RNN weight_hh_l0
    b_ih = jax.random.normal(ks[3], (D,), jnp.float32) * 0.1
    b_hh = jax.random.normal(ks[4], (D,), jnp.float32) * 0.1
    w_cls = jax.random.normal(ks[5], (NUM_CLASSES, D), jnp.float32) * 0.2
    b_cls = jax.random.normal(ks[6], (NUM_CLASSES,), jnp.float32) * 0.1

    x = jax.random.randint(ks[7], (B, T), 0, VOCAB, dtype=jnp.int32)

    params = prepare_params(emb_table, w_ih, w_hh, b_ih, b_hh, w_cls, b_cls)
    vals, idx, probs = torch_model_forward(x, params)
    jax.block_until_ready((vals, idx, probs))

    r_vals, r_idx, r_probs = ref_forward(
        x, emb_table, w_ih, w_hh, b_ih, b_hh, w_cls, b_cls)

    assert jnp.allclose(probs, r_probs, atol=1e-5), "softmax probs mismatch"
    assert jnp.allclose(vals, r_vals, atol=1e-5), "max values mismatch"
    assert jnp.array_equal(idx, r_idx.astype(jnp.int32)), "argmax mismatch"
    print("KERNEL_OK")
</pallas_src>

<mosaic_0001>
module attributes {stable_mosaic.version = 11 : i64} {
  func.func @rnn_classify_kernel(%arg0: memref<64x1xi32, #tpu.memory_space<vmem>>, %arg1: memref<128x128xf32, #tpu.memory_space<vmem>>, %arg2: memref<128x128xf32, #tpu.memory_space<vmem>>, %arg3: memref<128x128xf32, #tpu.memory_space<vmem>>, %arg4: memref<1x128xf32, #tpu.memory_space<vmem>>, %arg5: memref<8x128xf32, #tpu.memory_space<vmem>>) attributes {dimension_semantics = [], scalar_prefetch = 0 : i64, scratch_operands = 0 : i64, tpu.core_type = #tpu.core_type<tc>} {
    %c0 = arith.constant 0 : index
    %c0_0 = arith.constant 0 : index
    %0 = vector.load %arg0[%c0, %c0_0] : memref<64x1xi32, #tpu.memory_space<vmem>>, vector<64x1xi32>
    %1 = tpu.iota {dimensions = array<i32: 1>} : vector<64x128xi32>
    %2 = vector.broadcast %0 : vector<64x1xi32> to vector<64x128xi32>
    %3 = arith.cmpi eq, %2, %1 : vector<64x128xi32>
    %4 = arith.extui %3 : vector<64x128xi1> to vector<64x128xi32>
    %5 = arith.sitofp %4 : vector<64x128xi32> to vector<64x128xf32>
    %c0_1 = arith.constant 0 : index
    %c0_2 = arith.constant 0 : index
    %6 = vector.load %arg1[%c0_1, %c0_2] : memref<128x128xf32, #tpu.memory_space<vmem>>, vector<128x128xf32>
    %cst = arith.constant dense<0.000000e+00> : vector<64x128xf32>
    %7 = tpu.matmul %5, %6, %cst {dimension_numbers = #tpu.dot_dimension_numbers<[1], [0], [0], [1], [0, 0, 1, 1], [], []>} : vector<64x128xf32>, vector<128x128xf32>, vector<64x128xf32> -> vector<64x128xf32>
    %c0_3 = arith.constant 0 : index
    %c0_4 = arith.constant 0 : index
    %8 = vector.load %arg2[%c0_3, %c0_4] : memref<128x128xf32, #tpu.memory_space<vmem>>, vector<128x128xf32>
    %cst_5 = arith.constant 0.000000e+00 : f32
    %9 = vector.broadcast %cst_5 : f32 to vector<8x128xf32>
    %10 = vector.extract_strided_slice %7 {offsets = [0, 0], sizes = [8, 128], strides = [1, 1]} : vector<64x128xf32> to vector<8x128xf32>
    %cst_6 = arith.constant dense<0.000000e+00> : vector<8x128xf32>
    %11 = tpu.matmul %9, %8, %cst_6 {dimension_numbers = #tpu.dot_dimension_numbers<[1], [0], [0], [1], [0, 0, 1, 1], [], []>} : vector<8x128xf32>, vector<128x128xf32>, vector<8x128xf32> -> vector<8x128xf32>
    %12 = arith.addf %10, %11 : vector<8x128xf32>
    %13 = math.tanh %12 : vector<8x128xf32>
    %14 = vector.extract_strided_slice %7 {offsets = [8, 0], sizes = [8, 128], strides = [1, 1]} : vector<64x128xf32> to vector<8x128xf32>
    %cst_7 = arith.constant dense<0.000000e+00> : vector<8x128xf32>
    %15 = tpu.matmul %13, %8, %cst_7 {dimension_numbers = #tpu.dot_dimension_numbers<[1], [0], [0], [1], [0, 0, 1, 1], [], []>} : vector<8x128xf32>, vector<128x128xf32>, vector<8x128xf32> -> vector<8x128xf32>
    %16 = arith.addf %14, %15 : vector<8x128xf32>
    %17 = math.tanh %16 : vector<8x128xf32>
    %18 = vector.extract_strided_slice %7 {offsets = [16, 0], sizes = [8, 128], strides = [1, 1]} : vector<64x128xf32> to vector<8x128xf32>
    %cst_8 = arith.constant dense<0.000000e+00> : vector<8x128xf32>
    %19 = tpu.matmul %17, %8, %cst_8 {dimension_numbers = #tpu.dot_dimension_numbers<[1], [0], [0], [1], [0, 0, 1, 1], [], []>} : vector<8x128xf32>, vector<128x128xf32>, vector<8x128xf32> -> vector<8x128xf32>
    %20 = arith.addf %18, %19 : vector<8x128xf32>
    %21 = math.tanh %20 : vector<8x128xf32>
    %22 = vector.extract_strided_slice %7 {offsets = [24, 0], sizes = [8, 128], strides = [1, 1]} : vector<64x128xf32> to vector<8x128xf32>
    %cst_9 = arith.constant dense<0.000000e+00> : vector<8x128xf32>
    %23 = tpu.matmul %21, %8, %cst_9 {dimension_numbers = #tpu.dot_dimension_numbers<[1], [0], [0], [1], [0, 0, 1, 1], [], []>} : vector<8x128xf32>, vector<128x128xf32>, vector<8x128xf32> -> vector<8x128xf32>
    %24 = arith.addf %22, %23 : vector<8x128xf32>
    %25 = math.tanh %24 : vector<8x128xf32>
    %26 = vector.extract_strided_slice %7 {offsets = [32, 0], sizes = [8, 128], strides = [1, 1]} : vector<64x128xf32> to vector<8x128xf32>
    %cst_10 = arith.constant dense<0.000000e+00> : vector<8x128xf32>
    %27 = tpu.matmul %25, %8, %cst_10 {dimension_numbers = #tpu.dot_dimension_numbers<[1], [0], [0], [1], [0, 0, 1, 1], [], []>} : vector<8x128xf32>, vector<128x128xf32>, vector<8x128xf32> -> vector<8x128xf32>
    %28 = arith.addf %26, %27 : vector<8x128xf32>
    %29 = math.tanh %28 : vector<8x128xf32>
    %30 = vector.extract_strided_slice %7 {offsets = [40, 0], sizes = [8, 128], strides = [1, 1]} : vector<64x128xf32> to vector<8x128xf32>
    %cst_11 = arith.constant dense<0.000000e+00> : vector<8x128xf32>
    %31 = tpu.matmul %29, %8, %cst_11 {dimension_numbers = #tpu.dot_dimension_numbers<[1], [0], [0], [1], [0, 0, 1, 1], [], []>} : vector<8x128xf32>, vector<128x128xf32>, vector<8x128xf32> -> vector<8x128xf32>
    %32 = arith.addf %30, %31 : vector<8x128xf32>
    %33 = math.tanh %32 : vector<8x128xf32>
    %34 = vector.extract_strided_slice %7 {offsets = [48, 0], sizes = [8, 128], strides = [1, 1]} : vector<64x128xf32> to vector<8x128xf32>
    %cst_12 = arith.constant dense<0.000000e+00> : vector<8x128xf32>
    %35 = tpu.matmul %33, %8, %cst_12 {dimension_numbers = #tpu.dot_dimension_numbers<[1], [0], [0], [1], [0, 0, 1, 1], [], []>} : vector<8x128xf32>, vector<128x128xf32>, vector<8x128xf32> -> vector<8x128xf32>
    %36 = arith.addf %34, %35 : vector<8x128xf32>
    %37 = math.tanh %36 : vector<8x128xf32>
    %38 = vector.extract_strided_slice %7 {offsets = [56, 0], sizes = [8, 128], strides = [1, 1]} : vector<64x128xf32> to vector<8x128xf32>
    %cst_13 = arith.constant dense<0.000000e+00> : vector<8x128xf32>
    %39 = tpu.matmul %37, %8, %cst_13 {dimension_numbers = #tpu.dot_dimension_numbers<[1], [0], [0], [1], [0, 0, 1, 1], [], []>} : vector<8x128xf32>, vector<128x128xf32>, vector<8x128xf32> -> vector<8x128xf32>
    %40 = arith.addf %38, %39 : vector<8x128xf32>
    %41 = math.tanh %40 : vector<8x128xf32>
    %c0_14 = arith.constant 0 : index
    %c0_15 = arith.constant 0 : index
    %42 = vector.load %arg3[%c0_14, %c0_15] : memref<128x128xf32, #tpu.memory_space<vmem>>, vector<128x128xf32>
    %cst_16 = arith.constant dense<0.000000e+00> : vector<8x128xf32>
    %43 = tpu.matmul %41, %42, %cst_16 {dimension_numbers = #tpu.dot_dimension_numbers<[1], [0], [0], [1], [0, 0, 1, 1], [], []>} : vector<8x128xf32>, vector<128x128xf32>, vector<8x128xf32> -> vector<8x128xf32>
    %c0_17 = arith.constant 0 : index
    %c0_18 = arith.constant 0 : index
    %44 = vector.load %arg4[%c0_17, %c0_18] : memref<1x128xf32, #tpu.memory_space<vmem>>, vector<1x128xf32>
    %45 = vector.broadcast %44 : vector<1x128xf32> to vector<8x128xf32>
    %46 = arith.addf %43, %45 : vector<8x128xf32>
    %cst_19 = arith.constant dense<0xFF800000> : vector<8xf32>
    %47 = vector.multi_reduction <maximumf>, %46, %cst_19 [1] : vector<8x128xf32> to vector<8xf32>
    %48 = vector.shape_cast %47 : vector<8xf32> to vector<8x1xf32>
    %49 = vector.broadcast %48 : vector<8x1xf32> to vector<8x128xf32>
    %50 = arith.subf %46, %49 : vector<8x128xf32>
    %51 = math.exp %50 : vector<8x128xf32>
    %cst_20 = arith.constant dense<0.000000e+00> : vector<8xf32>
    %52 = vector.multi_reduction <add>, %51, %cst_20 [1] : vector<8x128xf32> to vector<8xf32>
    %53 = vector.shape_cast %52 : vector<8xf32> to vector<8x1xf32>
    %54 = tpu.reciprocal %53 : vector<8x1xf32> -> vector<8x1xf32>
    %55 = vector.broadcast %54 : vector<8x1xf32> to vector<8x128xf32>
    %56 = arith.mulf %51, %55 : vector<8x128xf32>
    %cst_21 = arith.constant dense<0xFF800000> : vector<8xf32>
    %57 = vector.multi_reduction <maximumf>, %56, %cst_21 [1] : vector<8x128xf32> to vector<8xf32>
    %58 = vector.shape_cast %57 : vector<8xf32> to vector<8x1xf32>
    %59 = tpu.iota {dimensions = array<i32: 1>} : vector<8x128xi32>
    %60 = vector.broadcast %58 : vector<8x1xf32> to vector<8x128xf32>
    %61 = arith.cmpf oeq, %56, %60 : vector<8x128xf32>
    %c128_i32 = arith.constant 128 : i32
    %62 = vector.broadcast %c128_i32 : i32 to vector<8x128xi32>
    %63 = arith.select %61, %59, %62 : vector<8x128xi1>, vector<8x128xi32>
    %cst_22 = arith.constant dense<2147483647> : vector<8xi32>
    %64 = vector.multi_reduction <minsi>, %63, %cst_22 [1] : vector<8x128xi32> to vector<8xi32>
    %65 = vector.shape_cast %64 : vector<8xi32> to vector<8x1xi32>
    %c6_i32 = arith.constant 6 : i32
    %66 = vector.broadcast %c6_i32 : i32 to vector<8x128xi32>
    %67 = arith.cmpi eq, %59, %66 : vector<8x128xi32>
    %cst_23 = arith.constant 0.000000e+00 : f32
    %68 = vector.shape_cast %58 : vector<8x1xf32> to vector<8x1xf32>
    %69 = vector.broadcast %68 : vector<8x1xf32> to vector<8x128xf32>
    %70 = vector.broadcast %cst_23 : f32 to vector<8x128xf32>
    %71 = arith.select %67, %69, %70 : vector<8x128xi1>, vector<8x128xf32>
    %72 = arith.addf %56, %71 : vector<8x128xf32>
    %c7_i32 = arith.constant 7 : i32
    %73 = vector.broadcast %c7_i32 : i32 to vector<8x128xi32>
    %74 = arith.cmpi eq, %59, %73 : vector<8x128xi32>
    %75 = arith.sitofp %65 : vector<8x1xi32> to vector<8x1xf32>
    %cst_24 = arith.constant 0.000000e+00 : f32
    %76 = vector.shape_cast %75 : vector<8x1xf32> to vector<8x1xf32>
    %77 = vector.broadcast %76 : vector<8x1xf32> to vector<8x128xf32>
    %78 = vector.broadcast %cst_24 : f32 to vector<8x128xf32>
    %79 = arith.select %74, %77, %78 : vector<8x128xi1>, vector<8x128xf32>
    %80 = arith.addf %72, %79 : vector<8x128xf32>
    %c0_25 = arith.constant 0 : index
    %c0_26 = arith.constant 0 : index
    %81 = vector.load %arg5[%c0_25, %c0_26] : memref<8x128xf32, #tpu.memory_space<vmem>>, vector<8x128xf32>
    tpu.vector_store %arg5[%c0_25, %c0_26], %80 {strides = array<i32>} : memref<8x128xf32, #tpu.memory_space<vmem>>, vector<8x128xf32>,
    return
  }
}

</mosaic_0001>

<bundles_post_ra>
// kernel: torch_model_forward.1
= control target key start
LH: loop header
LB: loop body
LE: loop exit
PB: predicated region body
PF: predicated region fallthrough
CT: control target
= control target key end

     0   :  { %10 = vsyncpa [#allocation3], 0  ;;  %s2043_s0 = inlined_call_operand.vmem [shape: s32[64,1], index: 0, kind: input, shape index: {}]   ;;  %s2044_s1 = inlined_call_operand.hbm [shape: f32[128,128], index: 1, kind: input, shape index: {}]   ;;  %s2045_s2 = inlined_call_operand.hbm [shape: f32[128,128], index: 2, kind: input, shape index: {}]   ;;  %s2046_s3 = inlined_call_operand.hbm [shape: f32[128,128], index: 3, kind: input, shape index: {}]   ;;  %s2047_s4 = inlined_call_operand.vmem [shape: f32[1,128], index: 4, kind: input, shape index: {}]   ;;  %s2048_s5 = inlined_call_operand.vmem [shape: f32[8,128], index: 5, kind: output, shape index: {}]  }
   0x1   :  { %11 = vsyncpa [#allocation5], 0  ;;  %s1614_s18 = smov [#allocation4]   ;;  %s1615_s20 = smov [#allocation2]  }
   0x2   :  { %s31_s19 = sshll.u32 %s1614_s18, 4  ;;  %s19_s21 = sshll.u32 %s1615_s20, 4  ;;  %s32_s19 = int_to_ptr.vmem [resolvable:$true] %s31_s19  ;;  %s20_s21 = int_to_ptr.vmem [resolvable:$true] %s19_s21 }
   0x3   :  { %s1558_s22 = scalar_lea.vmem %s32_s19, 2048  ;;  %p1563_p1 = scmp.lt.s32.totalorder %s32_s19, %s32_s19 }
   0x4   :  { %p1559_p0 = scmp.ne.s32.totalorder %s32_s19, %s1558_s22  ;;  %p1564_p2 = scmp.lt.s32.totalorder %s1558_s22, %s1558_s22 }
   0x6   :  { %p1565_p3 = por %p1564_p2, %p1563_p1 }
   0x8   :  { %p1566_p4 = pnand %p1565_p3, %p1559_p0 }
   0xa   :  { %1569 = shalt.err (!%p1566_p4)
}
   0xb   :  { %s1616_s23 = smov 128   ;;  %s1617_s24 = smov 8  }
   0xc   :  { %37 = dma.hbm_to_vmem [thread:$0]  %s2045_s2, 2048, %s32_s19, [#allocation5], %s1616_s23, %s1616_s23, %s1617_s24  }
   0xd   :  { %s1578_s27 = scalar_lea.vmem %s20_s21, 2048  ;;  %p1583_p6 = scmp.lt.s32.totalorder %s20_s21, %s20_s21 }
   0xe   :  { %p1579_p5 = scmp.ne.s32.totalorder %s20_s21, %s1578_s27  ;;  %p1584_p7 = scmp.lt.s32.totalorder %s1578_s27, %s1578_s27 }
  0x10   :  { %p1585_p8 = por %p1584_p7, %p1583_p6 }
  0x12   :  { %p1586_p9 = pnand %p1585_p8, %p1579_p5 }
  0x14   :  { %1589 = shalt.err (!%p1586_p9)
}
  0x15   :  { %25 = dma.hbm_to_vmem [thread:$0]  %s2044_s1, 2048, %s20_s21, [#allocation3], %s1616_s23, %s1616_s23, %s1617_s24  }
  0x16   :  { %s1618_s30 = smov [#allocation6]  }
  0x17   :  { %s43_s6 = sshll.u32 %s1618_s30, 4  ;;  %s44_s6 = int_to_ptr.vmem [resolvable:$true] %s43_s6 }
  0x18   :  { %s1598_s7 = scalar_lea.vmem %s44_s6, 2048  ;;  %p1603_p11 = scmp.lt.s32.totalorder %s44_s6, %s44_s6 }
  0x19   :  { %p1599_p10 = scmp.ne.s32.totalorder %s44_s6, %s1598_s7  ;;  %p1604_p12 = scmp.lt.s32.totalorder %s1598_s7, %s1598_s7 }
  0x1b   :  { %p1605_p13 = por %p1604_p12, %p1603_p11 }
  0x1d   :  { %p1606_p0 = pnand %p1605_p13, %p1599_p10 }
  0x1f   :  { %1609 = shalt.err (!%p1606_p0)
}
  0x20   :  { %49 = dma.hbm_to_vmem [thread:$0]  %s2046_s3, 2048, %s44_s6, [#allocation5], %s1616_s23, %s1616_s23, %s1617_s24  }
  0x21   :  { %1610 = dma.done.wait [#allocation3], 2048  }
  0x22   :  { %1611 = vsyncadd [#allocation3], 4294965248 }
  0x23   :  { %1612 = dma.done.wait [#allocation5], 4096  }
  0x24   :  { %1613 = vsyncadd [#allocation5], 4294963200  ;;  %v1619_v0 = vmov 0   ;;  %v1620_v1 = vmov 0.0   ;;  %v61_v2 = vld [vmem:[%s2043_s0] sm:$0xff]  ;;  %v63_v3 = vld [vmem:[%s2043_s0 + $0x10] sm:$0xff]  ;;  %v69_v42 = vlaneseq }
  0x25   :  { %1528 = vset.pattern.permute.xlu0 %v1619_v0  ;;  %1529 = vset.pattern.permute.xlu1 %v1619_v0  ;;  %v62_v4 = vld [vmem:[%s2043_s0 + $0x8] sm:$0xff]  ;;  %v64_v5 = vld [vmem:[%s2043_s0 + $0x18] sm:$0xff]  ;;  %vm1621_vm0 = vmmov 0   ;;  %v133_v8 = vld [vmem:[#allocation2 + $0x70] sm:$0xff]  ;;  %v1622_v46 = vmov 1.0  }
  0x26   :  { %1204 = vmatprep.subr.mxu1 %v1620_v1  ;;  %72 = vperm.xlu0 %1528, %v61_v2   ;;  %v134_v6 = vld [vmem:[#allocation2 + $0x78] sm:$0xff]  ;;  %v1680_v9 = vld [vmem:[#allocation4 + $0x70] sm:$0xff]  ;;  %v132_v10 = vld [vmem:[#allocation2 + $0x68] sm:$0xff]  ;;  %v1789_v43 = vand.u32 127, %v69_v42 }
  0x27   :  { %78 = vperm.xlu1 %1529, %v63_v3   ;;  %v1675_v7 = vld [vmem:[#allocation4 + $0x78] sm:$0xff]  ;;  %1236 = vmatprep.mubr.msk.f32.mxu1 %vm1621_vm0, %v1620_v1  ;;  %v1683_v11 = vld [vmem:[#allocation4 + $0x68] sm:$0xff]  ;;  %v65_v12 = vld [vmem:[%s2043_s0 + $0x20] sm:$0xff] }
  0x28   :  { %1160 = vmatprep.subr.mxu0 %v134_v6  ;;  %1205 = vmatpush3.msra.mxu1 %v1675_v7  ;;  %v66_v13 = vld [vmem:[%s2043_s0 + $0x28] sm:$0xff]  ;;  %v131_v14 = vld [vmem:[#allocation2 + $0x60] sm:$0xff]  ;;  %v67_v16 = vld [vmem:[%s2043_s0 + $0x30] sm:$0xff]  ;;  %vm952_vm11 = vcmp.eq.s32.totalorder %v1789_v43, 6  ;;  %vm955_vm12 = vcmp.eq.s32.totalorder %v1789_v43, 7 }
  0x29   :  { %1161 = vmatpush3.msra.mxu0 %v134_v6  ;;  %1206 = vmatprep.subr.mxu1 %v1620_v1  ;;  %v1694_v15 = vld [vmem:[#allocation4 + $0x60] sm:$0xff]  ;;  %v130_v17 = vld [vmem:[#allocation2 + $0x58] sm:$0xff]  ;;  %v129_v19 = vld [vmem:[#allocation2 + $0x50] sm:$0xff] }
  0x2a   :  { %75 = vperm.xlu0 %1528, %v62_v4   ;;  %1162 = vmatprep.subr.mxu0 %v133_v8  ;;  %v1701_v18 = vld [vmem:[#allocation4 + $0x58] sm:$0xff]  ;;  %v1704_v20 = vld [vmem:[#allocation4 + $0x50] sm:$0xff]  ;;  %v128_v21 = vld [vmem:[#allocation2 + $0x48] sm:$0xff] }
  0x2b   :  { %81 = vperm.xlu1 %1529, %v64_v5   ;;  %1207 = vmatpush3.msra.mxu1 %v1680_v9  ;;  %v1708_v22 = vld [vmem:[#allocation4 + $0x48] sm:$0xff]  ;;  %v127_v23 = vld [vmem:[#allocation2 + $0x40] sm:$0xff]  ;;  %v126_v25 = vld [vmem:[#allocation2 + $0x38] sm:$0xff] }
  0x2c   :  { %1163 = vmatpush3.msra.mxu0 %v133_v8  ;;  %1208 = vmatprep.subr.mxu1 %v1620_v1  ;;  %v1712_v24 = vld [vmem:[#allocation4 + $0x40] sm:$0xff]  ;;  %v1716_v26 = vld [vmem:[#allocation4 + $0x38] sm:$0xff]  ;;  %v125_v27 = vld [vmem:[#allocation2 + $0x30] sm:$0xff] }
  0x2d   :  { %1164 = vmatprep.subr.mxu0 %v132_v10  ;;  %1209 = vmatpush3.msra.mxu1 %v1683_v11  ;;  %v1720_v28 = vld [vmem:[#allocation4 + $0x30] sm:$0xff]  ;;  %v124_v29 = vld [vmem:[#allocation2 + $0x28] sm:$0xff]  ;;  %v123_v31 = vld [vmem:[#allocation2 + $0x20] sm:$0xff] }
  0x2e   :  { %84 = vperm.xlu0 %1528, %v65_v12   ;;  %1165 = vmatpush3.msra.mxu0 %v132_v10  ;;  %v1724_v30 = vld [vmem:[#allocation4 + $0x28] sm:$0xff]  ;;  %v1728_v32 = vld [vmem:[#allocation4 + $0x20] sm:$0xff]  ;;  %v122_v33 = vld [vmem:[#allocation2 + $0x18] sm:$0xff] }
  0x2f   :  { %87 = vperm.xlu1 %1529, %v66_v13   ;;  %1210 = vmatprep.subr.mxu1 %v1620_v1  ;;  %v1732_v34 = vld [vmem:[#allocation4 + $0x18] sm:$0xff]  ;;  %v121_v35 = vld [vmem:[#allocation2 + $0x10] sm:$0xff]  ;;  %v120_v37 = vld [vmem:[#allocation2 + $0x8] sm:$0xff] }
  0x30   :  { %1166 = vmatprep.subr.mxu0 %v131_v14  ;;  %1211 = vmatpush3.msra.mxu1 %v1694_v15  ;;  %v1736_v36 = vld [vmem:[#allocation4 + $0x10] sm:$0xff]  ;;  %v1740_v38 = vld [vmem:[#allocation4 + $0x8] sm:$0xff]  ;;  %v119_v39 = vld [vmem:[#allocation2] sm:$0xff] }
  0x31   :  { %1167 = vmatpush3.msra.mxu0 %v131_v14  ;;  %1212 = vmatprep.subr.mxu1 %v1620_v1  ;;  %v1744_v40 = vld [vmem:[#allocation4] sm:$0xff]  ;;  %v68_v41 = vld [vmem:[%s2043_s0 + $0x38] sm:$0xff] }
  0x32   :  { %90 = vperm.xlu0 %1528, %v67_v16   ;;  %1168 = vmatprep.subr.mxu0 %v130_v17 }
  0x33   :  { %1169 = vmatpush3.msra.mxu0 %v130_v17  ;;  %1213 = vmatpush3.msra.mxu1 %v1701_v18 }
  0x34   :  { %1170 = vmatprep.subr.mxu0 %v129_v19  ;;  %1214 = vmatprep.subr.mxu1 %v1620_v1 }
  0x35   :  { %1171 = vmatpush3.msra.mxu0 %v129_v19  ;;  %1215 = vmatpush3.msra.mxu1 %v1704_v20 }
  0x36   :  { %1172 = vmatprep.subr.mxu0 %v128_v21  ;;  %1216 = vmatprep.subr.mxu1 %v1620_v1 }
  0x37   :  { %1173 = vmatpush3.msra.mxu0 %v128_v21  ;;  %1217 = vmatpush3.msra.mxu1 %v1708_v22 }
  0x38   :  { %1174 = vmatprep.subr.mxu0 %v127_v23  ;;  %1218 = vmatprep.subr.mxu1 %v1620_v1 }
  0x39   :  { %1175 = vmatpush3.msra.mxu0 %v127_v23  ;;  %1219 = vmatpush3.msra.mxu1 %v1712_v24 }
  0x3a   :  { %1176 = vmatprep.subr.mxu0 %v126_v25  ;;  %1220 = vmatprep.subr.mxu1 %v1620_v1 }
  0x3b   :  { %1177 = vmatpush3.msra.mxu0 %v126_v25  ;;  %1221 = vmatpush3.msra.mxu1 %v1716_v26 }
  0x3c   :  { %1178 = vmatprep.subr.mxu0 %v125_v27  ;;  %1222 = vmatprep.subr.mxu1 %v1620_v1 }
  0x3d   :  { %1179 = vmatpush3.msra.mxu0 %v125_v27  ;;  %1223 = vmatpush3.msra.mxu1 %v1720_v28  ;;  %v842_v27 = vld [vmem:[#allocation6 + $0x50] sm:$0xff] }
  0x3e   :  { %1180 = vmatprep.subr.mxu0 %v124_v29  ;;  %1224 = vmatprep.subr.mxu1 %v1620_v1 }
  0x3f   :  { %1181 = vmatpush3.msra.mxu0 %v124_v29  ;;  %1225 = vmatpush3.msra.mxu1 %v1724_v30 }
  0x40   :  { %1182 = vmatprep.subr.mxu0 %v123_v31  ;;  %1226 = vmatprep.subr.mxu1 %v1620_v1 }
  0x41   :  { %1183 = vmatpush3.msra.mxu0 %v123_v31  ;;  %1227 = vmatpush3.msra.mxu1 %v1728_v32 }
  0x42   :  { %1184 = vmatprep.subr.mxu0 %v122_v33  ;;  %1228 = vmatprep.subr.mxu1 %v1620_v1 }
  0x43   :  { %1185 = vmatpush3.msra.mxu0 %v122_v33  ;;  %1229 = vmatpush3.msra.mxu1 %v1732_v34  ;;  %v840_v33 = vld [vmem:[#allocation6 + $0x40] sm:$0xff] }
  0x44   :  { %1186 = vmatprep.subr.mxu0 %v121_v35  ;;  %1230 = vmatprep.subr.mxu1 %v1620_v1 }
  0x45   :  { %1187 = vmatpush3.msra.mxu0 %v121_v35  ;;  %1231 = vmatpush3.msra.mxu1 %v1736_v36  ;;  %v838_v35 = vld [vmem:[#allocation6 + $0x30] sm:$0xff] }
  0x46   :  { %1188 = vmatprep.subr.mxu0 %v120_v37  ;;  %1232 = vmatprep.subr.mxu1 %v1620_v1 }
  0x47   :  { %1189 = vmatpush3.msra.mxu0 %v120_v37  ;;  %1233 = vmatpush3.msra.mxu1 %v1740_v38  ;;  %v836_v37 = vld [vmem:[#allocation6 + $0x20] sm:$0xff] }
  0x48   :  { %1190 = vmatprep.subr.mxu0 %v119_v39  ;;  %1234 = vmatprep.subr.mxu1 %v1620_v1 }
  0x49   :  { %1191 = vmatpush3.msra.mxu0 %v119_v39  ;;  %1235 = vmatpush3.msra.mxu1 %v1744_v40  ;;  %v834_v39 = vld [vmem:[#allocation6 + $0x10] sm:$0xff] }
  0x4a   :  { %1237 = vmatmul.mubr.f32.vlgmr.msra.gmra.mxu1 %v1620_v1  ;;  %93 = vperm.xlu1 %1529, %v68_v41   ;;  %v832_v41 = vld [vmem:[#allocation6] sm:$0xff] }
  0x4b   :  { %1239 = vmatprep.subr.mxu0 %v1620_v1  ;;  %1274 = vmatprep.subr.mxu1 %v1620_v1 }
  0x4c   :  { %1275 = vmatpush3.msra.mxu1 %v1675_v7  ;;  %1306 = vmatprep.mubr.msk.f32.mxu1 %vm1621_vm0, %v1620_v1 }
  0x4d   :  { %1276 = vmatprep.subr.mxu1 %v1620_v1 }
  0x4e   :  { %1277 = vmatpush3.msra.mxu1 %v1680_v9 }
  0x4f   :  { %1278 = vmatprep.subr.mxu1 %v1620_v1 }
  0x50   :  { %1279 = vmatpush3.msra.mxu1 %v1683_v11 }
  0x51   :  { %1280 = vmatprep.subr.mxu1 %v1620_v1 }
  0x52   :  { %1281 = vmatpush3.msra.mxu1 %v1694_v15 }
  0x53   :  { %1282 = vmatprep.subr.mxu1 %v1620_v1 }
  0x54   :  { %1283 = vmatpush3.msra.mxu1 %v1701_v18 }
  0x55   :  { %1284 = vmatprep.subr.mxu1 %v1620_v1 }
  0x56   :  { %1285 = vmatpush3.msra.mxu1 %v1704_v20 }
  0x57   :  { %1286 = vmatprep.subr.mxu1 %v1620_v1 }
  0x58   :  { %1287 = vmatpush3.msra.mxu1 %v1708_v22 }
  0x59   :  { %1288 = vmatprep.subr.mxu1 %v1620_v1 }
  0x5a   :  { %1289 = vmatpush3.msra.mxu1 %v1712_v24 }
  0x5b   :  { %1290 = vmatprep.subr.mxu1 %v1620_v1 }
  0x5c   :  { %1291 = vmatpush3.msra.mxu1 %v1716_v26 }
  0x5d   :  { %1292 = vmatprep.subr.mxu1 %v1620_v1 }
  0x5e   :  { %1293 = vmatpush3.msra.mxu1 %v1720_v28 }
  0x5f   :  { %1294 = vmatprep.subr.mxu1 %v1620_v1 }
  0x60   :  { %1295 = vmatpush3.msra.mxu1 %v1724_v30 }
  0x61   :  { %1296 = vmatprep.subr.mxu1 %v1620_v1 }
  0x62   :  { %1297 = vmatpush3.msra.mxu1 %v1728_v32 }
  0x63   :  { %1298 = vmatprep.subr.mxu1 %v1620_v1 }
  0x64   :  { %1299 = vmatpush3.msra.mxu1 %v1732_v34 }
  0x65   :  { %1300 = vmatprep.subr.mxu1 %v1620_v1 }
  0x66   :  { %1301 = vmatpush3.msra.mxu1 %v1736_v36 }
  0x67   :  { %1302 = vmatprep.subr.mxu1 %v1620_v1 }
  0x68   :  { %1303 = vmatpush3.msra.mxu1 %v1740_v38 }
  0x69   :  { %1304 = vmatprep.subr.mxu1 %v1620_v1 }
  0x6a   :  { %1305 = vmatpush3.msra.mxu1 %v1744_v40 }
  0x6b   :  { %1344 = vmatprep.subr.mxu1 %v1620_v1 }
  0xa1   :  { %v73_v44 = vpop.permute.xlu0 %72 }
  0xa2   :  { %v79_v45 = vpop.permute.xlu1 %78  ;;  %vm95_vm1 = vcmp.eq.s32.totalorder %v73_v44, %v1789_v43 }
  0xa3   :  { %1192 = vmatprep.mubr.msk.f32.mxu0 %vm95_vm1, %v1622_v46  ;;  %vm97_vm2 = vcmp.eq.s32.totalorder %v79_v45, %v1789_v43 }
  0xa5   :  { %v76_v47 = vpop.permute.xlu0 %75 }
  0xa6   :  { %v82_v48 = vpop.permute.xlu1 %81  ;;  %vm96_vm3 = vcmp.eq.s32.totalorder %v76_v47, %v1789_v43  ;;  %v982_v47 = vld [vmem:[%s2047_s4] ss:$0 sm:$0xff] }
  0xa7   :  { %1193 = vmatmul.mubr.msk.f32.vlgmr.msra.gmra.mxu0 %vm96_vm3, %v1622_v46  ;;  %vm98_vm4 = vcmp.eq.s32.totalorder %v82_v48, %v1789_v43 }
  0xa8   :  { %1195 = vmatprep.mubr.msk.f32.mxu0 %vm97_vm2, %v1622_v46  ;;  %1240 = vmatpush3.msra.mxu0 %v1675_v7 }
  0xa9   :  { %v85_v49 = vpop.permute.xlu0 %84  ;;  %1241 = vmatprep.subr.mxu0 %v1620_v1 }
  0xaa   :  { %v88_v50 = vpop.permute.xlu1 %87  ;;  %vm99_vm5 = vcmp.eq.s32.totalorder %v85_v49, %v1789_v43  ;;  %1242 = vmatpush3.msra.mxu0 %v1680_v9 }
  0xab   :  { %1196 = vmatmul.mubr.msk.f32.gmra.mxu0 %vm98_vm4, %v1622_v46  ;;  %1243 = vmatprep.subr.mxu0 %v1620_v1  ;;  %vm100_vm6 = vcmp.eq.s32.totalorder %v88_v50, %v1789_v43 }
  0xac   :  { %1198 = vmatprep.mubr.msk.f32.mxu0 %vm99_vm5, %v1622_v46  ;;  %1244 = vmatpush3.msra.mxu0 %v1683_v11 }
  0xad   :  { %v91_v51 = vpop.permute.xlu0 %90  ;;  %1245 = vmatprep.subr.mxu0 %v1620_v1 }
  0xae   :  { %vm101_vm7 = vcmp.eq.s32.totalorder %v91_v51, %v1789_v43  ;;  %1246 = vmatpush3.msra.mxu0 %v1694_v15 }
  0xaf   :  { %1199 = vmatmul.mubr.msk.f32.gmra.mxu0 %vm100_vm6, %v1622_v46  ;;  %1247 = vmatprep.subr.mxu0 %v1620_v1 }
  0xb0   :  { %1201 = vmatprep.mubr.msk.f32.mxu0 %vm101_vm7, %v1622_v46  ;;  %1248 = vmatpush3.msra.mxu0 %v1701_v18 }
  0xb1   :  { %1249 = vmatprep.subr.mxu0 %v1620_v1 }
  0xb2   :  { %1250 = vmatpush3.msra.mxu0 %v1704_v20 }
  0xb3   :  { %1251 = vmatprep.subr.mxu0 %v1620_v1 }
  0xb4   :  { %1252 = vmatpush3.msra.mxu0 %v1708_v22 }
  0xb5   :  { %1253 = vmatprep.subr.mxu0 %v1620_v1 }
  0xb6   :  { %1254 = vmatpush3.msra.mxu0 %v1712_v24 }
  0xb7   :  { %1255 = vmatprep.subr.mxu0 %v1620_v1 }
  0xb8   :  { %1256 = vmatpush3.msra.mxu0 %v1716_v26 }
  0xb9   :  { %1257 = vmatprep.subr.mxu0 %v1620_v1 }
  0xba   :  { %1258 = vmatpush3.msra.mxu0 %v1720_v28 }
  0xbb   :  { %1259 = vmatprep.subr.mxu0 %v1620_v1 }
  0xbc   :  { %1260 = vmatpush3.msra.mxu0 %v1724_v30 }
  0xbd   :  { %1261 = vmatprep.subr.mxu0 %v1620_v1 }
  0xbe   :  { %1262 = vmatpush3.msra.mxu0 %v1728_v32 }
  0xbf   :  { %1263 = vmatprep.subr.mxu0 %v1620_v1 }
  0xc0   :  { %1264 = vmatpush3.msra.mxu0 %v1732_v34 }
  0xc1   :  { %1265 = vmatprep.subr.mxu0 %v1620_v1 }
  0xc2   :  { %1266 = vmatpush3.msra.mxu0 %v1736_v36 }
  0xc3   :  { %1267 = vmatprep.subr.mxu0 %v1620_v1 }
  0xc4   :  { %1268 = vmatpush3.msra.mxu0 %v1740_v38 }
  0xc5   :  { %v94_v52 = vpop.permute.xlu1 %93  ;;  %1269 = vmatprep.subr.mxu0 %v1620_v1 }
  0xc6   :  { %vm102_vm8 = vcmp.eq.s32.totalorder %v94_v52, %v1789_v43  ;;  %1270 = vmatpush3.msra.mxu0 %v1744_v40 }
  0xc7   :  { %1202 = vmatmul.mubr.msk.f32.gmra.mxu0 %vm102_vm8, %v1622_v46  ;;  %1309 = vmatprep.subr.mxu0 %v1620_v1 }
  0xc8   :  { %1271 = vmatprep.mubr.msk.f32.mxu0 %vm1621_vm0, %v1620_v1 }
 0x10a   :  { %v322_v53 = vpop.f32.mrf.mxu1 }
 0x10c   :  { %v1238_v54 = vpop.f32.mrf.mxu1 }
 0x167   :  { %v1194_v55 = vpop.f32.mrf.mxu0 }
 0x169   :  { %v201_v56 = vpop.f32.mrf.mxu0 }
 0x16a   :  { %v326_v57 = vadd.f32 %v322_v53, %v201_v56 }
 0x16b   :  { %v1867_v59 = vpop.f32.mrf.mxu0 }
 0x16c   :  { %1530 = vtanh.f32 %v326_v57 }
 0x16d   :  { %v211_v60 = vpop.f32.mrf.mxu0 }
 0x16f   :  { %v1869_v61 = vpop.f32.mrf.mxu0 }
 0x171   :  { %v1871_v62 = vpop.f32.mrf.mxu0 }
 0x179   :  { %v1531_v58 = vpop.eup %1530 }
 0x17a   :  { %1272 = vmatmul.mubr.f32.vlgmr.msra.gmra.mxu0 %v1531_v58 }
 0x17b   :  { %1310 = vmatpush3.msra.mxu0 %v1675_v7  ;;  %1341 = vmatprep.mubr.msk.f32.mxu0 %vm1621_vm0, %v1620_v1 }
 0x17c   :  { %1311 = vmatprep.subr.mxu0 %v1620_v1 }
 0x17d   :  { %1312 = vmatpush3.msra.mxu0 %v1680_v9 }
 0x17e   :  { %1313 = vmatprep.subr.mxu0 %v1620_v1 }
 0x17f   :  { %1314 = vmatpush3.msra.mxu0 %v1683_v11 }
 0x180   :  { %1315 = vmatprep.subr.mxu0 %v1620_v1 }
 0x181   :  { %1316 = vmatpush3.msra.mxu0 %v1694_v15 }
 0x182   :  { %1317 = vmatprep.subr.mxu0 %v1620_v1 }
 0x183   :  { %1318 = vmatpush3.msra.mxu0 %v1701_v18 }
 0x184   :  { %1319 = vmatprep.subr.mxu0 %v1620_v1 }
 0x185   :  { %1320 = vmatpush3.msra.mxu0 %v1704_v20 }
 0x186   :  { %1321 = vmatprep.subr.mxu0 %v1620_v1 }
 0x187   :  { %1322 = vmatpush3.msra.mxu0 %v1708_v22  ;;  %v1873_v63 = vpop.f32.mrf.mxu0 }
 0x188   :  { %1323 = vmatprep.subr.mxu0 %v1620_v1 }
 0x189   :  { %1324 = vmatpush3.msra.mxu0 %v1712_v24  ;;  %v1875_v0 = vpop.f32.mrf.mxu0 }
 0x18a   :  { %1325 = vmatprep.subr.mxu0 %v1620_v1 }
 0x18b   :  { %1326 = vmatpush3.msra.mxu0 %v1716_v26 }
 0x18c   :  { %1327 = vmatprep.subr.mxu0 %v1620_v1 }
 0x18d   :  { %1328 = vmatpush3.msra.mxu0 %v1720_v28 }
 0x18e   :  { %1329 = vmatprep.subr.mxu0 %v1620_v1 }
 0x18f   :  { %1330 = vmatpush3.msra.mxu0 %v1724_v30 }
 0x190   :  { %1331 = vmatprep.subr.mxu0 %v1620_v1 }
 0x191   :  { %1332 = vmatpush3.msra.mxu0 %v1728_v32 }
 0x192   :  { %1333 = vmatprep.subr.mxu0 %v1620_v1 }
 0x193   :  { %1334 = vmatpush3.msra.mxu0 %v1732_v34 }
 0x194   :  { %1335 = vmatprep.subr.mxu0 %v1620_v1 }
 0x195   :  { %1336 = vmatpush3.msra.mxu0 %v1736_v36 }
 0x196   :  { %1337 = vmatprep.subr.mxu0 %v1620_v1 }
 0x197   :  { %1338 = vmatpush3.msra.mxu0 %v1740_v38 }
 0x198   :  { %1339 = vmatprep.subr.mxu0 %v1620_v1 }
 0x199   :  { %1340 = vmatpush3.msra.mxu0 %v1744_v40 }
 0x19a   :  { %1379 = vmatprep.subr.mxu0 %v1620_v1 }
 0x23a   :  { %v394_v2 = vpop.f32.mrf.mxu0 }
 0x23b   :  { %v398_v3 = vadd.f32 %v1194_v55, %v394_v2 }
 0x23c   :  { %v1273_v4 = vpop.f32.mrf.mxu0 }
 0x23d   :  { %1532 = vtanh.f32 %v398_v3 }
 0x24a   :  { %v1533_v5 = vpop.eup %1532 }
 0x24b   :  { %1307 = vmatmul.mubr.f32.vlgmr.msra.gmra.mxu1 %v1533_v5 }
 0x24c   :  { %1345 = vmatpush3.msra.mxu1 %v1675_v7  ;;  %1376 = vmatprep.mubr.msk.f32.mxu1 %vm1621_vm0, %v1620_v1 }
 0x24d   :  { %1346 = vmatprep.subr.mxu1 %v1620_v1 }
 0x24e   :  { %1347 = vmatpush3.msra.mxu1 %v1680_v9 }
 0x24f   :  { %1348 = vmatprep.subr.mxu1 %v1620_v1 }
 0x250   :  { %1349 = vmatpush3.msra.mxu1 %v1683_v11 }
 0x251   :  { %1350 = vmatprep.subr.mxu1 %v1620_v1 }
 0x252   :  { %1351 = vmatpush3.msra.mxu1 %v1694_v15 }
 0x253   :  { %1352 = vmatprep.subr.mxu1 %v1620_v1 }
 0x254   :  { %1353 = vmatpush3.msra.mxu1 %v1701_v18 }
 0x255   :  { %1354 = vmatprep.subr.mxu1 %v1620_v1 }
 0x256   :  { %1355 = vmatpush3.msra.mxu1 %v1704_v20 }
 0x257   :  { %1356 = vmatprep.subr.mxu1 %v1620_v1 }
 0x258   :  { %1357 = vmatpush3.msra.mxu1 %v1708_v22 }
 0x259   :  { %1358 = vmatprep.subr.mxu1 %v1620_v1 }
 0x25a   :  { %1359 = vmatpush3.msra.mxu1 %v1712_v24 }
 0x25b   :  { %1360 = vmatprep.subr.mxu1 %v1620_v1 }
 0x25c   :  { %1361 = vmatpush3.msra.mxu1 %v1716_v26 }
 0x25d   :  { %1362 = vmatprep.subr.mxu1 %v1620_v1 }
 0x25e   :  { %1363 = vmatpush3.msra.mxu1 %v1720_v28 }
 0x25f   :  { %1364 = vmatprep.subr.mxu1 %v1620_v1 }
 0x260   :  { %1365 = vmatpush3.msra.mxu1 %v1724_v30 }
 0x261   :  { %1366 = vmatprep.subr.mxu1 %v1620_v1 }
 0x262   :  { %1367 = vmatpush3.msra.mxu1 %v1728_v32 }
 0x263   :  { %1368 = vmatprep.subr.mxu1 %v1620_v1 }
 0x264   :  { %1369 = vmatpush3.msra.mxu1 %v1732_v34 }
 0x265   :  { %1370 = vmatprep.subr.mxu1 %v1620_v1 }
 0x266   :  { %1371 = vmatpush3.msra.mxu1 %v1736_v36 }
 0x267   :  { %1372 = vmatprep.subr.mxu1 %v1620_v1 }
 0x268   :  { %1373 = vmatpush3.msra.mxu1 %v1740_v38 }
 0x269   :  { %1374 = vmatprep.subr.mxu1 %v1620_v1 }
 0x26a   :  { %1375 = vmatpush3.msra.mxu1 %v1744_v40 }
 0x26b   :  { %1414 = vmatprep.subr.mxu1 %v1620_v1 }
 0x30b   :  { %v466_v6 = vpop.f32.mrf.mxu1 }
 0x30c   :  { %v470_v8 = vadd.f32 %v466_v6, %v211_v60 }
 0x30d   :  { %v1308_v10 = vpop.f32.mrf.mxu1 }
 0x30e   :  { %1534 = vtanh.f32 %v470_v8 }
 0x31b   :  { %v1535_v12 = vpop.eup %1534 }
 0x31c   :  { %1342 = vmatmul.mubr.f32.vlgmr.msra.gmra.mxu0 %v1535_v12 }
 0x31d   :  { %1380 = vmatpush3.msra.mxu0 %v1675_v7  ;;  %1411 = vmatprep.mubr.msk.f32.mxu0 %vm1621_vm0, %v1620_v1 }
 0x31e   :  { %1381 = vmatprep.subr.mxu0 %v1620_v1 }
 0x31f   :  { %1382 = vmatpush3.msra.mxu0 %v1680_v9 }
 0x320   :  { %1383 = vmatprep.subr.mxu0 %v1620_v1 }
 0x321   :  { %1384 = vmatpush3.msra.mxu0 %v1683_v11 }
 0x322   :  { %1385 = vmatprep.subr.mxu0 %v1620_v1 }
 0x323   :  { %1386 = vmatpush3.msra.mxu0 %v1694_v15 }
 0x324   :  { %1387 = vmatprep.subr.mxu0 %v1620_v1 }
 0x325   :  { %1388 = vmatpush3.msra.mxu0 %v1701_v18 }
 0x326   :  { %1389 = vmatprep.subr.mxu0 %v1620_v1 }
 0x327   :  { %1390 = vmatpush3.msra.mxu0 %v1704_v20 }
 0x328   :  { %1391 = vmatprep.subr.mxu0 %v1620_v1 }
 0x329   :  { %1392 = vmatpush3.msra.mxu0 %v1708_v22 }
 0x32a   :  { %1393 = vmatprep.subr.mxu0 %v1620_v1 }
 0x32b   :  { %1394 = vmatpush3.msra.mxu0 %v1712_v24 }
 0x32c   :  { %1395 = vmatprep.subr.mxu0 %v1620_v1 }
 0x32d   :  { %1396 = vmatpush3.msra.mxu0 %v1716_v26 }
 0x32e   :  { %1397 = vmatprep.subr.mxu0 %v1620_v1 }
 0x32f   :  { %1398 = vmatpush3.msra.mxu0 %v1720_v28 }
 0x330   :  { %1399 = vmatprep.subr.mxu0 %v1620_v1 }
 0x331   :  { %1400 = vmatpush3.msra.mxu0 %v1724_v30 }
 0x332   :  { %1401 = vmatprep.subr.mxu0 %v1620_v1 }
 0x333   :  { %1402 = vmatpush3.msra.mxu0 %v1728_v32 }
 0x334   :  { %1403 = vmatprep.subr.mxu0 %v1620_v1 }
 0x335   :  { %1404 = vmatpush3.msra.mxu0 %v1732_v34 }
 0x336   :  { %1405 = vmatprep.subr.mxu0 %v1620_v1 }
 0x337   :  { %1406 = vmatpush3.msra.mxu0 %v1736_v36 }
 0x338   :  { %1407 = vmatprep.subr.mxu0 %v1620_v1 }
 0x339   :  { %1408 = vmatpush3.msra.mxu0 %v1740_v38 }
 0x33a   :  { %1409 = vmatprep.subr.mxu0 %v1620_v1 }
 0x33b   :  { %1410 = vmatpush3.msra.mxu0 %v1744_v40 }
 0x33c   :  { %1449 = vmatprep.subr.mxu0 %v1620_v1 }
 0x3dc   :  { %v538_v13 = vpop.f32.mrf.mxu0 }
 0x3dd   :  { %v542_v14 = vadd.f32 %v1867_v59, %v538_v13 }
 0x3de   :  { %v1343_v16 = vpop.f32.mrf.mxu0 }
 0x3df   :  { %1536 = vtanh.f32 %v542_v14 }
 0x3ec   :  { %v1537_v17 = vpop.eup %1536 }
 0x3ed   :  { %1377 = vmatmul.mubr.f32.vlgmr.msra.gmra.mxu1 %v1537_v17 }
 0x3ee   :  { %1415 = vmatpush3.msra.mxu1 %v1675_v7  ;;  %1446 = vmatprep.mubr.msk.f32.mxu1 %vm1621_vm0, %v1620_v1 }
 0x3ef   :  { %1416 = vmatprep.subr.mxu1 %v1620_v1 }
 0x3f0   :  { %1417 = vmatpush3.msra.mxu1 %v1680_v9 }
 0x3f1   :  { %1418 = vmatprep.subr.mxu1 %v1620_v1 }
 0x3f2   :  { %1419 = vmatpush3.msra.mxu1 %v1683_v11 }
 0x3f3   :  { %1420 = vmatprep.subr.mxu1 %v1620_v1 }
 0x3f4   :  { %1421 = vmatpush3.msra.mxu1 %v1694_v15 }
 0x3f5   :  { %1422 = vmatprep.subr.mxu1 %v1620_v1 }
 0x3f6   :  { %1423 = vmatpush3.msra.mxu1 %v1701_v18 }
 0x3f7   :  { %1424 = vmatprep.subr.mxu1 %v1620_v1 }
 0x3f8   :  { %1425 = vmatpush3.msra.mxu1 %v1704_v20 }
 0x3f9   :  { %1426 = vmatprep.subr.mxu1 %v1620_v1 }
 0x3fa   :  { %1427 = vmatpush3.msra.mxu1 %v1708_v22 }
 0x3fb   :  { %1428 = vmatprep.subr.mxu1 %v1620_v1 }
 0x3fc   :  { %1429 = vmatpush3.msra.mxu1 %v1712_v24 }
 0x3fd   :  { %1430 = vmatprep.subr.mxu1 %v1620_v1 }
 0x3fe   :  { %1431 = vmatpush3.msra.mxu1 %v1716_v26 }
 0x3ff   :  { %1432 = vmatprep.subr.mxu1 %v1620_v1 }
 0x400   :  { %1433 = vmatpush3.msra.mxu1 %v1720_v28 }
 0x401   :  { %1434 = vmatprep.subr.mxu1 %v1620_v1 }
 0x402   :  { %1435 = vmatpush3.msra.mxu1 %v1724_v30 }
 0x403   :  { %1436 = vmatprep.subr.mxu1 %v1620_v1 }
 0x404   :  { %1437 = vmatpush3.msra.mxu1 %v1728_v32 }
 0x405   :  { %1438 = vmatprep.subr.mxu1 %v1620_v1 }
 0x406   :  { %1439 = vmatpush3.msra.mxu1 %v1732_v34 }
 0x407   :  { %1440 = vmatprep.subr.mxu1 %v1620_v1 }
 0x408   :  { %1441 = vmatpush3.msra.mxu1 %v1736_v36 }
 0x409   :  { %1442 = vmatprep.subr.mxu1 %v1620_v1 }
 0x40a   :  { %1443 = vmatpush3.msra.mxu1 %v1740_v38 }
 0x40b   :  { %1444 = vmatprep.subr.mxu1 %v1620_v1 }
 0x40c   :  { %1445 = vmatpush3.msra.mxu1 %v1744_v40 }
 0x40d   :  { %1484 = vmatprep.subr.mxu1 %v1620_v1 }
 0x4ad   :  { %v610_v19 = vpop.f32.mrf.mxu1 }
 0x4ae   :  { %v614_v21 = vadd.f32 %v610_v19, %v1871_v62 }
 0x4af   :  { %v1378_v23 = vpop.f32.mrf.mxu1 }
 0x4b0   :  { %1538 = vtanh.f32 %v614_v21 }
 0x4bd   :  { %v1539_v25 = vpop.eup %1538 }
 0x4be   :  { %1412 = vmatmul.mubr.f32.vlgmr.msra.gmra.mxu0 %v1539_v25 }
 0x4bf   :  { %1450 = vmatpush3.msra.mxu0 %v1675_v7  ;;  %1481 = vmatprep.mubr.msk.f32.mxu0 %vm1621_vm0, %v1620_v1 }
 0x4c0   :  { %1451 = vmatprep.subr.mxu0 %v1620_v1 }
 0x4c1   :  { %1452 = vmatpush3.msra.mxu0 %v1680_v9 }
 0x4c2   :  { %1453 = vmatprep.subr.mxu0 %v1620_v1 }
 0x4c3   :  { %1454 = vmatpush3.msra.mxu0 %v1683_v11 }
 0x4c4   :  { %1455 = vmatprep.subr.mxu0 %v1620_v1 }
 0x4c5   :  { %1456 = vmatpush3.msra.mxu0 %v1694_v15 }
 0x4c6   :  { %1457 = vmatprep.subr.mxu0 %v1620_v1 }
 0x4c7   :  { %1458 = vmatpush3.msra.mxu0 %v1701_v18  ;;  %v847_v18 = vld [vmem:[#allocation6 + $0x78] sm:$0xff] }
 0x4c8   :  { %1459 = vmatprep.subr.mxu0 %v1620_v1 }
 0x4c9   :  { %1460 = vmatpush3.msra.mxu0 %v1704_v20  ;;  %v846_v20 = vld [vmem:[#allocation6 + $0x70] sm:$0xff] }
 0x4ca   :  { %1461 = vmatprep.subr.mxu0 %v1620_v1 }
 0x4cb   :  { %1462 = vmatpush3.msra.mxu0 %v1708_v22  ;;  %v845_v22 = vld [vmem:[#allocation6 + $0x68] sm:$0xff] }
 0x4cc   :  { %1463 = vmatprep.subr.mxu0 %v1620_v1 }
 0x4cd   :  { %1464 = vmatpush3.msra.mxu0 %v1712_v24  ;;  %v844_v24 = vld [vmem:[#allocation6 + $0x60] sm:$0xff] }
 0x4ce   :  { %1465 = vmatprep.subr.mxu0 %v1620_v1 }
 0x4cf   :  { %1466 = vmatpush3.msra.mxu0 %v1716_v26  ;;  %v843_v26 = vld [vmem:[#allocation6 + $0x58] sm:$0xff] }
 0x4d0   :  { %1467 = vmatprep.subr.mxu0 %v1620_v1 }
 0x4d1   :  { %1468 = vmatpush3.msra.mxu0 %v1720_v28  ;;  %v841_v28 = vld [vmem:[#allocation6 + $0x48] sm:$0xff] }
 0x4d2   :  { %1469 = vmatprep.subr.mxu0 %v1620_v1 }
 0x4d3   :  { %1470 = vmatpush3.msra.mxu0 %v1724_v30 }
 0x4d4   :  { %1471 = vmatprep.subr.mxu0 %v1620_v1 }
 0x4d5   :  { %1472 = vmatpush3.msra.mxu0 %v1728_v32 }
 0x4d6   :  { %1473 = vmatprep.subr.mxu0 %v1620_v1 }
 0x4d7   :  { %1474 = vmatpush3.msra.mxu0 %v1732_v34  ;;  %v839_v34 = vld [vmem:[#allocation6 + $0x38] sm:$0xff] }
 0x4d8   :  { %1475 = vmatprep.subr.mxu0 %v1620_v1 }
 0x4d9   :  { %1476 = vmatpush3.msra.mxu0 %v1736_v36  ;;  %v837_v36 = vld [vmem:[#allocation6 + $0x28] sm:$0xff] }
 0x4da   :  { %1477 = vmatprep.subr.mxu0 %v1620_v1 }
 0x4db   :  { %1478 = vmatpush3.msra.mxu0 %v1740_v38  ;;  %v835_v38 = vld [vmem:[#allocation6 + $0x18] sm:$0xff] }
 0x4dc   :  { %1479 = vmatprep.subr.mxu0 %v1620_v1 }
 0x4dd   :  { %1480 = vmatpush3.msra.mxu0 %v1744_v40  ;;  %v833_v40 = vld [vmem:[#allocation6 + $0x8] sm:$0xff] }
 0x57e   :  { %v682_v7 = vpop.f32.mrf.mxu0 }
 0x57f   :  { %v686_v9 = vadd.f32 %v1869_v61, %v682_v7 }
 0x580   :  { %v1413_v11 = vpop.f32.mrf.mxu0 }
 0x581   :  { %1540 = vtanh.f32 %v686_v9 }
 0x58e   :  { %v1541_v15 = vpop.eup %1540 }
 0x58f   :  { %1447 = vmatmul.mubr.f32.vlgmr.msra.gmra.mxu1 %v1541_v15 }
 0x590   :  { %1516 = vmatprep.mubr.msk.f32.mxu1 %vm1621_vm0, %v1620_v1  ;;  %1485 = vmatpush3.msra.mxu1 %v847_v18 }
 0x591   :  { %1486 = vmatprep.subr.mxu1 %v1620_v1 }
 0x592   :  { %1487 = vmatpush3.msra.mxu1 %v846_v20 }
 0x593   :  { %1488 = vmatprep.subr.mxu1 %v1620_v1 }
 0x594   :  { %1489 = vmatpush3.msra.mxu1 %v845_v22 }
 0x595   :  { %1490 = vmatprep.subr.mxu1 %v1620_v1 }
 0x596   :  { %1491 = vmatpush3.msra.mxu1 %v844_v24 }
 0x597   :  { %1492 = vmatprep.subr.mxu1 %v1620_v1 }
 0x598   :  { %1493 = vmatpush3.msra.mxu1 %v843_v26 }
 0x599   :  { %1494 = vmatprep.subr.mxu1 %v1620_v1 }
 0x59a   :  { %1495 = vmatpush3.msra.mxu1 %v842_v27 }
 0x59b   :  { %1496 = vmatprep.subr.mxu1 %v1620_v1 }
 0x59c   :  { %1497 = vmatpush3.msra.mxu1 %v841_v28 }
 0x59d   :  { %1498 = vmatprep.subr.mxu1 %v1620_v1 }
 0x59e   :  { %1499 = vmatpush3.msra.mxu1 %v840_v33 }
 0x59f   :  { %1500 = vmatprep.subr.mxu1 %v1620_v1 }
 0x5a0   :  { %1501 = vmatpush3.msra.mxu1 %v839_v34 }
 0x5a1   :  { %1502 = vmatprep.subr.mxu1 %v1620_v1 }
 0x5a2   :  { %1503 = vmatpush3.msra.mxu1 %v838_v35 }
 0x5a3   :  { %1504 = vmatprep.subr.mxu1 %v1620_v1 }
 0x5a4   :  { %1505 = vmatpush3.msra.mxu1 %v837_v36 }
 0x5a5   :  { %1506 = vmatprep.subr.mxu1 %v1620_v1 }
 0x5a6   :  { %1507 = vmatpush3.msra.mxu1 %v836_v37 }
 0x5a7   :  { %1508 = vmatprep.subr.mxu1 %v1620_v1 }
 0x5a8   :  { %1509 = vmatpush3.msra.mxu1 %v835_v38 }
 0x5a9   :  { %1510 = vmatprep.subr.mxu1 %v1620_v1 }
 0x5aa   :  { %1511 = vmatpush3.msra.mxu1 %v834_v39 }
 0x5ab   :  { %1512 = vmatprep.subr.mxu1 %v1620_v1 }
 0x5ac   :  { %1513 = vmatpush3.msra.mxu1 %v833_v40 }
 0x5ad   :  { %1514 = vmatprep.subr.mxu1 %v1620_v1 }
 0x5ae   :  { %1515 = vmatpush3.msra.mxu1 %v832_v41 }
 0x64f   :  { %v754_v29 = vpop.f32.mrf.mxu1 }
 0x650   :  { %v758_v30 = vadd.f32 %v754_v29, %v1875_v0 }
 0x651   :  { %v1448_v31 = vpop.f32.mrf.mxu1 }
 0x652   :  { %1542 = vtanh.f32 %v758_v30 }
 0x65f   :  { %v1543_v32 = vpop.eup %1542 }
 0x660   :  { %1482 = vmatmul.mubr.f32.vlgmr.msra.gmra.mxu0 %v1543_v32 }
 0x720   :  { %v826_v42 = vpop.f32.mrf.mxu0 }
 0x721   :  { %v830_v44 = vadd.f32 %v1873_v63, %v826_v42 }
 0x722   :  { %v1483_v45 = vpop.f32.mrf.mxu0 }
 0x723   :  { %1544 = vtanh.f32 %v830_v44 }
 0x730   :  { %v1545_v46 = vpop.eup %1544 }
 0x731   :  { %1517 = vmatmul.mubr.f32.vlgmr.msra.gmra.mxu1 %v1545_v46 }
 0x7f1   :  { %v921_v48 = vpop.f32.mrf.mxu1 }
 0x7f2   :  { %v922_v49 = vadd.f32 %v982_v47, %v921_v48 }
 0x7f3   :  { %v1518_v50 = vpop.f32.mrf.mxu1 }
 0x7f4   :  { %925 = vmax.xlane.f32.xlu0 %v922_v49 }
 0x87d   :  { %v926_v51 = vpop.xlane.xlu0 %925 }
 0x87e   :  { %v927_v52 = vsub.f32 %v922_v49, %v926_v51 }
 0x880   :  { %v928_v53 = vmul.f32 1.442695, %v927_v52 }
 0x882   :  { %1546 = vpow2.f32 %v928_v53 }
 0x88f   :  { %v1547_v1 = vpop.eup %1546 }
 0x890   :  { %930 = vadd.xlane.f32.xlu1 %v1547_v1 }
 0x919   :  { %v931_v54 = vpop.xlane.xlu1 %930 }
 0x91a   :  { %1548 = vrcp.f32 %v931_v54 }
 0x927   :  { %v1549_v55 = vpop.eup %1548 }
 0x928   :  { %v933_v56 = vmul.f32 %v1549_v55, %v1547_v1 }
 0x92a   :  { %934 = vmax.xlane.f32.xlu0 %v933_v56 }
 0x9b3   :  { %v935_v57 = vpop.xlane.xlu0 %934 }
 0x9b4   :  { %vm936_vm9 = vcmp.eq.f32.partialorder %v933_v56, %v935_v57  ;;  %v953_v6 = vsel %vm952_vm11, %v935_v57, 0.0 }
 0x9b5   :  { %v937_v58 = vsel %vm936_vm9, %v1789_v43, 128  ;;  %v954_v12 = vadd.f32 %v953_v6, %v933_v56 }
 0x9b6   :  { %v939_v59 = vshra.s32 %v937_v58, 16  ;;  %v938_v61 = vand.u32 65535, %v937_v58 }
 0x9b8   :  { %v941_v60 = vcvt.s32.f32 %v939_v59  ;;  %v940_v63 = vcvt.s32.f32 %v938_v61 }
 0x9ba   :  { %942 = vmin.xlane.f32.xlu0 %v941_v60 }
 0xa43   :  { %v943_v62 = vpop.xlane.xlu0 %942 }
 0xa44   :  { %vm944_vm10 = vcmp.eq.f32.partialorder %v941_v60, %v943_v62  ;;  %v949_v2 = vcvt.f32.s32 %v943_v62 }
 0xa45   :  { %v945_v0 = vsel %vm944_vm10, %v940_v63, inf }
 0xa46   :  { %946 = vmin.xlane.f32.xlu1 %v945_v0  ;;  %v950_v4 = vshll.u32 %v949_v2, 16 }
 0xacf   :  { %v947_v3 = vpop.xlane.xlu1 %946 }
 0xad0   :  { %v948_v5 = vcvt.f32.s32 %v947_v3 }
 0xad2   :  { %v951_v8 = vadd.s32 %v950_v4, %v948_v5 }
 0xad4   :  { %v956_v10 = vcvt.s32.f32 %v951_v8 }
 0xad6   :  { %v957_v13 = vsel %vm955_vm12, %v956_v10, 0.0 }
 0xad7   :  { %v958_v14 = vadd.f32 %v957_v13, %v954_v12 }
 0xad9   :  { %959 = vst [vmem:[%s2048_s5] sm:$0xff] %v958_v14 }
 0xada   :  { %964 = vsyncpa [#allocation3], 1 }
 0xadb   :  { %965 = vsyncpa [#allocation5], 1 }

</bundles_post_ra>
